<compile_context>
chip_gen: v7x
topology: tpu7x:2x2x1
jax: 0.10.0
libtpu: 0.0.40
codegen_flags: <defaults>
</compile_context>

<pallas_src>
import functools
import math

import jax
import jax.numpy as jnp
from jax.experimental import pallas as pl
from jax.experimental.pallas import tpu as pltpu


# ---------------------------------------------------------------------------
# Kernel: whole decoder step for one batch tile (all L layers + fc_out fused).
# ---------------------------------------------------------------------------
def _decoder_lstm_kernel(
    x_ref,        # (TB, P)         f32  layer-0 input (dropout applied, padded to P)
    h0_ref,       # (L, TB, H)      f32  previous hidden states (one per layer)
    c0_ref,       # (L, TB, H)      f32  previous cell states
    wcat_ref,     # (L, P+H+1, 4H)  bf16 [W_ih^T ; W_hh^T ; (b_ih+b_hh)] per layer
    wfc_ref,      # (H, Fp)         bf16 fc_out weight^T, zero-padded to Fp lanes
    bfc_ref,      # (1, Fp)         f32  fc_out bias, zero-padded
    state_ref,    # out (L, TB, 2H) f32  packed [h_n | c_n] per layer
    pred_ref,     # out (TB, Fp)    f32  fc_out(h_top), lane-dense
    cat_scratch,  # VMEM (TB, P+H+1) f32 fused-matmul LHS: [input | h_prev | 1]
):
    L, _, H = h0_ref.shape
    P = x_ref.shape[1]
    assert cat_scratch.shape[1] == P + H + 1

    # Stage the layer-0 input and the bias "ones" column once.
    cat_scratch[:, 0:P] = x_ref[...]
    cat_scratch[:, P + H:P + H + 1] = jnp.ones(
        (cat_scratch.shape[0], 1), cat_scratch.dtype)

    h_new = None
    # Static unroll: L is tiny and the layer recurrence is inherently sequential.
    for l in range(L):
        # Current layer's recurrent hidden state goes in columns [P, P+H).
        cat_scratch[:, P:P + H] = h0_ref[l]

        # Single fused MXU matmul (bias folded in via the ones column):
        #   gates = [inp | h_prev | 1] @ [W_ih^T ; W_hh^T ; b]   -> (TB, 4H)
        gates = jnp.dot(
            cat_scratch[...].astype(wcat_ref.dtype), wcat_ref[l],
            preferred_element_type=jnp.float32)

        # PyTorch LSTM gate order: i, f, g, o.
        i_g = jax.nn.sigmoid(gates[:, 0 * H:1 * H])
        f_g = jax.nn.sigmoid(gates[:, 1 * H:2 * H])
        g_g = jnp.tanh(gates[:, 2 * H:3 * H])
        o_g = jax.nn.sigmoid(gates[:, 3 * H:4 * H])

        c_new = f_g * c0_ref[l] + i_g * g_g      # cell state kept in f32
        h_new = o_g * jnp.tanh(c_new)

        # Packed, lane-dense state output: [h | c] for this layer.
        state_ref[l, :, 0:H] = h_new.astype(state_ref.dtype)
        state_ref[l, :, H:2 * H] = c_new.astype(state_ref.dtype)

        if l + 1 < L:
            # Next layer's input is this layer's hidden state.  Columns [H, P)
            # (present only when output_dim > H) still hold stale layer-0 input;
            # they are cancelled by the zero-padded W_ih^T rows of layers >= 1
            # (harmless unless the padded input contains NaN/Inf).
            cat_scratch[:, 0:H] = h_new

    # Fused output projection on the top layer's hidden state (128-lane-dense Fp).
    pred_ref[...] = (
        jnp.dot(h_new.astype(wfc_ref.dtype), wfc_ref[...],
                preferred_element_type=jnp.float32)
        + bfc_ref[...]
    ).astype(pred_ref.dtype)


# ---------------------------------------------------------------------------
# Parameter construction / packing (PyTorch layout -> kernel layout)
# ---------------------------------------------------------------------------
def init_decoder_params(key, output_dim, hidden_dim, n_layers, dtype=jnp.float32):
    """PyTorch-layout DecoderRNN parameters (LSTM gate order i, f, g, o)."""
    scale = 1.0 / math.sqrt(hidden_dim)
    keys = jax.random.split(key, 4 * n_layers + 2)
    params = {"wih": [], "whh": [], "bih": [], "bhh": []}
    idx = 0
    for layer in range(n_layers):
        in_dim = output_dim if layer == 0 else hidden_dim
        params["wih"].append(
            jax.random.uniform(keys[idx], (4 * hidden_dim, in_dim), dtype, -scale, scale)); idx += 1
        params["whh"].append(
            jax.random.uniform(keys[idx], (4 * hidden_dim, hidden_dim), dtype, -scale, scale)); idx += 1
        params["bih"].append(
            jax.random.uniform(keys[idx], (4 * hidden_dim,), dtype, -scale, scale)); idx += 1
        params["bhh"].append(
            jax.random.uniform(keys[idx], (4 * hidden_dim,), dtype, -scale, scale)); idx += 1
    params["wfc"] = jax.random.uniform(
        keys[idx], (2 * output_dim, hidden_dim), dtype, -scale, scale); idx += 1
    params["bfc"] = jax.random.uniform(
        keys[idx], (2 * output_dim,), dtype, -scale, scale)
    return params


def pack_decoder_params(torch_params, hidden_dim, weight_dtype=jnp.bfloat16):
    """Transpose / pad / concatenate PyTorch-layout params for the fused kernel."""
    H = hidden_dim
    wih_l, whh_l = torch_params["wih"], torch_params["whh"]
    bih_l, bhh_l = torch_params["bih"], torch_params["bhh"]
    in0 = wih_l[0].shape[1]
    P = max(in0, H)                                   # common layer-input width

    wcat = []
    for Wih, Whh, bi, bh in zip(wih_l, whh_l, bih_l, bhh_l):
        Wt = Wih.T                                    # (in_l, 4H)
        if Wt.shape[0] < P:                           # zero-pad input rows
            Wt = jnp.pad(Wt, ((0, P - Wt.shape[0]), (0, 0)))
        layer = jnp.concatenate(
            [Wt, Whh.T, (bi + bh)[None, :]], axis=0)  # (P+H+1, 4H)
        wcat.append(layer)

    wfc = torch_params["wfc"].T                       # (H, 2O)
    F = wfc.shape[1]
    Fp = ((F + 127) // 128) * 128                     # lane-dense output width
    wfc = jnp.pad(wfc, ((0, 0), (0, Fp - F)))
    bfc = jnp.pad(torch_params["bfc"], (0, Fp - F))[None, :]

    return {
        "wcat": jnp.stack(wcat).astype(weight_dtype),  # (L, P+H+1, 4H) bf16
        "wfc": wfc.astype(weight_dtype),               # (H, Fp)        bf16
        "bfc": bfc.astype(jnp.float32),                # (1, Fp)        f32
        "P": P,
        "F": F,
    }


def _batch_tiling(B):
    """Return (tb, n_btiles, Bp).  >=2 tiles when B >= 16 so v7x megacore shards."""
    if B >= 16:
        n_btiles = max(2, (B + 511) // 512)            # cap tile at ~512 rows
        tb = ((B + n_btiles - 1) // n_btiles + 7) // 8 * 8
        return tb, n_btiles, n_btiles * tb
    return B, 1, B


# ---------------------------------------------------------------------------
# Wrapper: full DecoderRNN.forward (LSTM, single decoder step)
# ---------------------------------------------------------------------------
def decoder_rnn_forward(x, hidden, packed, *, dropout_p=0.1, training=False,
                        dropout_key=None):
    """Returns (pred_mu, pred_log_sigma, (h_n, c_n)) — same as the PyTorch forward."""
    if x.ndim == 3:
        assert x.shape[1] == 1, "decoder step expects seq_len == 1"
        x = x[:, 0, :]
    h0, c0 = hidden
    B, in_dim = x.shape
    L, _, H = h0.shape
    wcat, wfc, bfc = packed["wcat"], packed["wfc"], packed["bfc"]
    P, F = packed["P"], packed["F"]
    Pcat, G = wcat.shape[1], wcat.shape[2]
    Fp = wfc.shape[1]
    out_dim = F // 2

    # nn.Dropout on the decoder input (identity in eval mode). Done in plain JAX
    # (tiny, not the hot path) to keep TPU-only PRNG primitives out of the kernel.
    if training and dropout_p > 0.0:
        if dropout_key is None:
            raise ValueError("training=True requires dropout_key")
        keep = jax.random.bernoulli(dropout_key, 1.0 - dropout_p, x.shape)
        x = jnp.where(keep, x / (1.0 - dropout_p), 0.0).astype(x.dtype)
    # TODO(synk): nn.LSTM inter-layer dropout (training-only, n_layers>1) and the
    # 'GRU'/'RNN' cell variants are not implemented in-kernel; eval-mode LSTM
    # (the module default) forward semantics are exact.
    # TODO(synk): for an autoregressive decode loop, fuse T time steps into one
    # kernel (extra "arbitrary" time axis, state carried in VMEM) so the weight
    # stack is not re-streamed from HBM every token.

    x = x.astype(jnp.float32)
    if P > in_dim:                                    # pad layer-0 input to width P
        x = jnp.pad(x, ((0, 0), (0, P - in_dim)))

    # v7x VMEM guard: the resident weight stack (wcat + wfc, bf16) must fit on-chip
    # (64 MiB physical on v7x, 128 MiB on v5e/v6e).  Tiny at realistic H here.
    weight_bytes = wcat.size * wcat.dtype.itemsize + wfc.size * wfc.dtype.itemsize
    if weight_bytes > 40 * 1024 * 1024:
        # TODO(synk): tile the 4H output dim over an extra grid axis for very large H.
        raise NotImplementedError("weight stack too large for resident-VMEM kernel")

    tb, n_btiles, Bp = _batch_tiling(B)
    if Bp > B:                                        # zero-pad batch for even tiles
        x = jnp.pad(x, ((0, Bp - B), (0, 0)))
        h0p = jnp.pad(h0, ((0, 0), (0, Bp - B), (0, 0)))
        c0p = jnp.pad(c0, ((0, 0), (0, Bp - B), (0, 0)))
    else:
        h0p, c0p = h0, c0

    state, pred = pl.pallas_call(
        _decoder_lstm_kernel,
        grid=(n_btiles,),
        in_specs=[
            pl.BlockSpec((tb, P), lambda bi: (bi, 0)),           # x (padded)
            pl.BlockSpec((L, tb, H), lambda bi: (0, bi, 0)),     # h0 (all layers)
            pl.BlockSpec((L, tb, H), lambda bi: (0, bi, 0)),     # c0 (all layers)
            pl.BlockSpec((L, Pcat, G), lambda bi: (0, 0, 0)),    # fused weights, resident
            pl.BlockSpec((H, Fp), lambda bi: (0, 0)),            # fc weight^T, resident
            pl.BlockSpec((1, Fp), lambda bi: (0, 0)),            # fc bias, resident
        ],
        out_specs=(
            pl.BlockSpec((L, tb, 2 * H), lambda bi: (0, bi, 0)),  # packed [h_n | c_n]
            pl.BlockSpec((tb, Fp), lambda bi: (bi, 0)),           # prediction (lane-dense)
        ),
        out_shape=(
            jax.ShapeDtypeStruct((L, Bp, 2 * H), h0.dtype),
            jax.ShapeDtypeStruct((Bp, Fp), jnp.float32),
        ),
        scratch_shapes=[pltpu.VMEM((tb, Pcat), jnp.float32)],
        compiler_params=pltpu.CompilerParams(
            dimension_semantics=("parallel",),
            vmem_limit_bytes=32 * 1024 * 1024,
        ),
    )(x, h0p, c0p, wcat, wfc, bfc)

    hn = state[:, :B, :H]
    cn = state[:, :B, H:]
    pred = pred[:B, :F]
    return pred[:, :out_dim], pred[:, out_dim:], (hn, cn)


# ---------------------------------------------------------------------------
# Pure-JAX reference (mirrors the PyTorch forward in eval mode, f32 weights)
# ---------------------------------------------------------------------------
def decoder_rnn_reference(x, hidden, torch_params):
    if x.ndim == 3:
        x = x[:, 0, :]
    h0, c0 = hidden
    L, _, H = h0.shape
    inp = x
    hs, cs = [], []
    for l in range(L):
        gates = (inp @ torch_params["wih"][l].T + torch_params["bih"][l]
                 + h0[l] @ torch_params["whh"][l].T + torch_params["bhh"][l])
        i_g = jax.nn.sigmoid(gates[:, 0 * H:1 * H])
        f_g = jax.nn.sigmoid(gates[:, 1 * H:2 * H])
        g_g = jnp.tanh(gates[:, 2 * H:3 * H])
        o_g = jax.nn.sigmoid(gates[:, 3 * H:4 * H])
        c = f_g * c0[l] + i_g * g_g
        h = o_g * jnp.tanh(c)
        hs.append(h)
        cs.append(c)
        inp = h
    pred = hs[-1] @ torch_params["wfc"].T + torch_params["bfc"]
    O = pred.shape[1] // 2
    return pred[:, :O], pred[:, O:], (jnp.stack(hs), jnp.stack(cs))


if __name__ == "__main__":
    key = jax.random.PRNGKey(0)
    B, OUT, HID, LAYERS = 2, 8, 32, 2          # batch, output_dim, hidden_dim, n_layers

    k_x, k_h, k_c, k_p = jax.random.split(key, 4)
    x = jax.random.normal(k_x, (B, 1, OUT), dtype=jnp.float32)      # (B, seq=1, output_dim)
    h0 = jax.random.normal(k_h, (LAYERS, B, HID), dtype=jnp.float32)
    c0 = jax.random.normal(k_c, (LAYERS, B, HID), dtype=jnp.float32)

    torch_params = init_decoder_params(k_p, OUT, HID, LAYERS)
    packed = pack_decoder_params(torch_params, HID)   # bf16 weights by default

    # Eval-mode forward (dropout is identity) — deterministic, checked vs f32 reference.
    mu, log_sigma, (hn, cn) = decoder_rnn_forward(
        x, (h0, c0), packed, dropout_p=0.1, training=False)
    mu, log_sigma, hn, cn = jax.block_until_ready((mu, log_sigma, hn, cn))

    mu_r, ls_r, (hn_r, cn_r) = decoder_rnn_reference(x, (h0, c0), torch_params)

    assert mu.shape == (B, OUT) and log_sigma.shape == (B, OUT)
    assert hn.shape == (LAYERS, B, HID) and cn.shape == (LAYERS, B, HID)
    # Tolerance accounts for bf16 weight packing (weights ~U(-0.18, 0.18)).
    for got, want in ((mu, mu_r), (log_sigma, ls_r), (hn, hn_r), (cn, cn_r)):
        assert float(jnp.max(jnp.abs(got - want))) < 3e-2, "mismatch vs reference"

    # Exercise the training path once (input dropout via jax.random, same kernel).
    out_train = decoder_rnn_forward(
        x, (h0, c0), packed, dropout_p=0.1, training=True,
        dropout_key=jax.random.PRNGKey(1))
    jax.block_until_ready(out_train)

    # Exercise the multi-tile batch path (B >= 16 -> >=2 "parallel" tiles on v7x).
    Bw = 20
    kw = jax.random.split(jax.random.PRNGKey(2), 3)
    xw = jax.random.normal(kw[0], (Bw, 1, OUT), dtype=jnp.float32)
    h0w = jax.random.normal(kw[1], (LAYERS, Bw, HID), dtype=jnp.float32)
    c0w = jax.random.normal(kw[2], (LAYERS, Bw, HID), dtype=jnp.float32)
    mu_w, ls_w, (hn_w, cn_w) = decoder_rnn_forward(xw, (h0w, c0w), packed)
    jax.block_until_ready((mu_w, ls_w, hn_w, cn_w))
    mu_wr, ls_wr, (hn_wr, cn_wr) = decoder_rnn_reference(xw, (h0w, c0w), torch_params)
    for got, want in ((mu_w, mu_wr), (ls_w, ls_wr), (hn_w, hn_wr), (cn_w, cn_wr)):
        assert float(jnp.max(jnp.abs(got - want))) < 3e-2, "mismatch vs reference (B=20)"

    print("KERNEL_OK")
</pallas_src>

<mosaic_0001>
module attributes {stable_mosaic.version = 11 : i64} {
  func.func @_decoder_lstm_kernel(%arg0: i32, %arg1: memref<2x32xf32, #tpu.memory_space<vmem>>, %arg2: memref<2x2x32xf32, #tpu.memory_space<vmem>>, %arg3: memref<2x2x32xf32, #tpu.memory_space<vmem>>, %arg4: memref<2x65x128xbf16, #tpu.memory_space<vmem>>, %arg5: memref<32x128xbf16, #tpu.memory_space<vmem>>, %arg6: memref<1x128xf32, #tpu.memory_space<vmem>>, %arg7: memref<2x2x64xf32, #tpu.memory_space<vmem>>, %arg8: memref<2x128xf32, #tpu.memory_space<vmem>>, %arg9: memref<2x65xf32, #tpu.memory_space<vmem>>) attributes {dimension_semantics = [#tpu.dimension_semantics<parallel>], iteration_bounds = array<i64: 1>, scalar_prefetch = 0 : i64, scratch_operands = 1 : i64, tpu.core_type = #tpu.core_type<tc>, window_params = [{transform_indices = @transform_0, window_bounds = array<i64: 2, 32>}, {transform_indices = @transform_1, window_bounds = array<i64: 2, 2, 32>}, {transform_indices = @transform_2, window_bounds = array<i64: 2, 2, 32>}, {pipeline_mode = #tpu.pipeline_mode<synchronous>, transform_indices = @transform_3, window_bounds = array<i64: 2, 65, 128>}, {pipeline_mode = #tpu.pipeline_mode<synchronous>, transform_indices = @transform_4, window_bounds = array<i64: 32, 128>}, {pipeline_mode = #tpu.pipeline_mode<synchronous>, transform_indices = @transform_5, window_bounds = array<i64: 1, 128>}, {transform_indices = @transform_6, window_bounds = array<i64: 2, 2, 64>}, {transform_indices = @transform_7, window_bounds = array<i64: 2, 128>}]} {
    %c0 = arith.constant 0 : index
    %c0_0 = arith.constant 0 : index
    %0 = vector.load %arg1[%c0, %c0_0] : memref<2x32xf32, #tpu.memory_space<vmem>>, vector<2x32xf32>
    %c0_1 = arith.constant 0 : index
    %c0_2 = arith.constant 0 : index
    %1 = vector.load %arg9[%c0_1, %c0_2] : memref<2x65xf32, #tpu.memory_space<vmem>>, vector<2x32xf32>
    tpu.vector_store %arg9[%c0_1, %c0_2], %0 {strides = array<i32>} : memref<2x65xf32, #tpu.memory_space<vmem>>, vector<2x32xf32>,
    %cst = arith.constant 1.000000e+00 : f32
    %2 = vector.broadcast %cst : f32 to vector<2x1xf32>
    %c0_3 = arith.constant 0 : index
    %c64 = arith.constant 64 : index
    %3 = vector.load %arg9[%c0_3, %c64] : memref<2x65xf32, #tpu.memory_space<vmem>>, vector<2x1xf32>
    tpu.vector_store %arg9[%c0_3, %c64], %2 {strides = array<i32>} : memref<2x65xf32, #tpu.memory_space<vmem>>, vector<2x1xf32>,
    %c0_4 = arith.constant 0 : index
    %c0_5 = arith.constant 0 : index
    %c0_6 = arith.constant 0 : index
    %4 = vector.load %arg2[%c0_4, %c0_5, %c0_6] : memref<2x2x32xf32, #tpu.memory_space<vmem>>, vector<1x2x32xf32>
    %5 = vector.shape_cast %4 : vector<1x2x32xf32> to vector<2x32xf32>
    %c0_7 = arith.constant 0 : index
    %c32 = arith.constant 32 : index
    %6 = vector.load %arg9[%c0_7, %c32] : memref<2x65xf32, #tpu.memory_space<vmem>>, vector<2x32xf32>
    tpu.vector_store %arg9[%c0_7, %c32], %5 {strides = array<i32>} : memref<2x65xf32, #tpu.memory_space<vmem>>, vector<2x32xf32>,
    %c0_8 = arith.constant 0 : index
    %c0_9 = arith.constant 0 : index
    %7 = vector.load %arg9[%c0_8, %c0_9] : memref<2x65xf32, #tpu.memory_space<vmem>>, vector<2x65xf32>
    %8 = arith.truncf %7 : vector<2x65xf32> to vector<2x65xbf16>
    %c0_10 = arith.constant 0 : index
    %c0_11 = arith.constant 0 : index
    %c0_12 = arith.constant 0 : index
    %9 = vector.load %arg4[%c0_10, %c0_11, %c0_12] : memref<2x65x128xbf16, #tpu.memory_space<vmem>>, vector<1x65x128xbf16>
    %10 = vector.shape_cast %9 : vector<1x65x128xbf16> to vector<65x128xbf16>
    %cst_13 = arith.constant dense<0.000000e+00> : vector<2x128xf32>
    %11 = tpu.matmul %8, %10, %cst_13 {dimension_numbers = #tpu.dot_dimension_numbers<[1], [0], [0], [1], [0, 0, 1, 1], [], []>} : vector<2x65xbf16>, vector<65x128xbf16>, vector<2x128xf32> -> vector<2x128xf32>
    %12 = vector.extract_strided_slice %11 {offsets = [0, 0], sizes = [2, 32], strides = [1, 1]} : vector<2x128xf32> to vector<2x32xf32>
    %13 = arith.negf %12 : vector<2x32xf32>
    %14 = math.exp %13 : vector<2x32xf32>
    %cst_14 = arith.constant 1.000000e+00 : f32
    %15 = vector.broadcast %cst_14 : f32 to vector<2x32xf32>
    %16 = arith.addf %15, %14 : vector<2x32xf32>
    %17 = arith.divf %15, %16 : vector<2x32xf32>
    %18 = vector.extract_strided_slice %11 {offsets = [0, 32], sizes = [2, 32], strides = [1, 1]} : vector<2x128xf32> to vector<2x32xf32>
    %19 = arith.negf %18 : vector<2x32xf32>
    %20 = math.exp %19 : vector<2x32xf32>
    %cst_15 = arith.constant 1.000000e+00 : f32
    %21 = vector.broadcast %cst_15 : f32 to vector<2x32xf32>
    %22 = arith.addf %21, %20 : vector<2x32xf32>
    %23 = arith.divf %21, %22 : vector<2x32xf32>
    %24 = vector.extract_strided_slice %11 {offsets = [0, 64], sizes = [2, 32], strides = [1, 1]} : vector<2x128xf32> to vector<2x32xf32>
    %25 = math.tanh %24 : vector<2x32xf32>
    %26 = vector.extract_strided_slice %11 {offsets = [0, 96], sizes = [2, 32], strides = [1, 1]} : vector<2x128xf32> to vector<2x32xf32>
    %27 = arith.negf %26 : vector<2x32xf32>
    %28 = math.exp %27 : vector<2x32xf32>
    %cst_16 = arith.constant 1.000000e+00 : f32
    %29 = vector.broadcast %cst_16 : f32 to vector<2x32xf32>
    %30 = arith.addf %29, %28 : vector<2x32xf32>
    %31 = arith.divf %29, %30 : vector<2x32xf32>
    %c0_17 = arith.constant 0 : index
    %c0_18 = arith.constant 0 : index
    %c0_19 = arith.constant 0 : index
    %32 = vector.load %arg3[%c0_17, %c0_18, %c0_19] : memref<2x2x32xf32, #tpu.memory_space<vmem>>, vector<1x2x32xf32>
    %33 = vector.shape_cast %32 : vector<1x2x32xf32> to vector<2x32xf32>
    %34 = arith.mulf %23, %33 : vector<2x32xf32>
    %35 = arith.mulf %17, %25 : vector<2x32xf32>
    %36 = arith.addf %34, %35 : vector<2x32xf32>
    %37 = math.tanh %36 : vector<2x32xf32>
    %38 = arith.mulf %31, %37 : vector<2x32xf32>
    %c0_20 = arith.constant 0 : index
    %c0_21 = arith.constant 0 : index
    %c0_22 = arith.constant 0 : index
    %39 = vector.load %arg7[%c0_20, %c0_21, %c0_22] : memref<2x2x64xf32, #tpu.memory_space<vmem>>, vector<1x2x32xf32>
    %40 = vector.shape_cast %39 : vector<1x2x32xf32> to vector<2x32xf32>
    %41 = vector.shape_cast %38 : vector<2x32xf32> to vector<1x2x32xf32>
    tpu.vector_store %arg7[%c0_20, %c0_21, %c0_22], %41 {strides = array<i32>} : memref<2x2x64xf32, #tpu.memory_space<vmem>>, vector<1x2x32xf32>,
    %c0_23 = arith.constant 0 : index
    %c0_24 = arith.constant 0 : index
    %c32_25 = arith.constant 32 : index
    %42 = vector.load %arg7[%c0_23, %c0_24, %c32_25] : memref<2x2x64xf32, #tpu.memory_space<vmem>>, vector<1x2x32xf32>
    %43 = vector.shape_cast %42 : vector<1x2x32xf32> to vector<2x32xf32>
    %44 = vector.shape_cast %36 : vector<2x32xf32> to vector<1x2x32xf32>
    tpu.vector_store %arg7[%c0_23, %c0_24, %c32_25], %44 {strides = array<i32>} : memref<2x2x64xf32, #tpu.memory_space<vmem>>, vector<1x2x32xf32>,
    %c0_26 = arith.constant 0 : index
    %c0_27 = arith.constant 0 : index
    %45 = vector.load %arg9[%c0_26, %c0_27] : memref<2x65xf32, #tpu.memory_space<vmem>>, vector<2x32xf32>
    tpu.vector_store %arg9[%c0_26, %c0_27], %38 {strides = array<i32>} : memref<2x65xf32, #tpu.memory_space<vmem>>, vector<2x32xf32>,
    %c1 = arith.constant 1 : index
    %c0_28 = arith.constant 0 : index
    %c0_29 = arith.constant 0 : index
    %46 = vector.load %arg2[%c1, %c0_28, %c0_29] : memref<2x2x32xf32, #tpu.memory_space<vmem>>, vector<1x2x32xf32>
    %47 = vector.shape_cast %46 : vector<1x2x32xf32> to vector<2x32xf32>
    %c0_30 = arith.constant 0 : index
    %c32_31 = arith.constant 32 : index
    %48 = vector.load %arg9[%c0_30, %c32_31] : memref<2x65xf32, #tpu.memory_space<vmem>>, vector<2x32xf32>
    tpu.vector_store %arg9[%c0_30, %c32_31], %47 {strides = array<i32>} : memref<2x65xf32, #tpu.memory_space<vmem>>, vector<2x32xf32>,
    %c0_32 = arith.constant 0 : index
    %c0_33 = arith.constant 0 : index
    %49 = vector.load %arg9[%c0_32, %c0_33] : memref<2x65xf32, #tpu.memory_space<vmem>>, vector<2x65xf32>
    %50 = arith.truncf %49 : vector<2x65xf32> to vector<2x65xbf16>
    %c1_34 = arith.constant 1 : index
    %c0_35 = arith.constant 0 : index
    %c0_36 = arith.constant 0 : index
    %51 = vector.load %arg4[%c1_34, %c0_35, %c0_36] : memref<2x65x128xbf16, #tpu.memory_space<vmem>>, vector<1x65x128xbf16>
    %52 = vector.shape_cast %51 : vector<1x65x128xbf16> to vector<65x128xbf16>
    %cst_37 = arith.constant dense<0.000000e+00> : vector<2x128xf32>
    %53 = tpu.matmul %50, %52, %cst_37 {dimension_numbers = #tpu.dot_dimension_numbers<[1], [0], [0], [1], [0, 0, 1, 1], [], []>} : vector<2x65xbf16>, vector<65x128xbf16>, vector<2x128xf32> -> vector<2x128xf32>
    %54 = vector.extract_strided_slice %53 {offsets = [0, 0], sizes = [2, 32], strides = [1, 1]} : vector<2x128xf32> to vector<2x32xf32>
    %55 = arith.negf %54 : vector<2x32xf32>
    %56 = math.exp %55 : vector<2x32xf32>
    %cst_38 = arith.constant 1.000000e+00 : f32
    %57 = vector.broadcast %cst_38 : f32 to vector<2x32xf32>
    %58 = arith.addf %57, %56 : vector<2x32xf32>
    %59 = arith.divf %57, %58 : vector<2x32xf32>
    %60 = vector.extract_strided_slice %53 {offsets = [0, 32], sizes = [2, 32], strides = [1, 1]} : vector<2x128xf32> to vector<2x32xf32>
    %61 = arith.negf %60 : vector<2x32xf32>
    %62 = math.exp %61 : vector<2x32xf32>
    %cst_39 = arith.constant 1.000000e+00 : f32
    %63 = vector.broadcast %cst_39 : f32 to vector<2x32xf32>
    %64 = arith.addf %63, %62 : vector<2x32xf32>
    %65 = arith.divf %63, %64 : vector<2x32xf32>
    %66 = vector.extract_strided_slice %53 {offsets = [0, 64], sizes = [2, 32], strides = [1, 1]} : vector<2x128xf32> to vector<2x32xf32>
    %67 = math.tanh %66 : vector<2x32xf32>
    %68 = vector.extract_strided_slice %53 {offsets = [0, 96], sizes = [2, 32], strides = [1, 1]} : vector<2x128xf32> to vector<2x32xf32>
    %69 = arith.negf %68 : vector<2x32xf32>
    %70 = math.exp %69 : vector<2x32xf32>
    %cst_40 = arith.constant 1.000000e+00 : f32
    %71 = vector.broadcast %cst_40 : f32 to vector<2x32xf32>
    %72 = arith.addf %71, %70 : vector<2x32xf32>
    %73 = arith.divf %71, %72 : vector<2x32xf32>
    %c1_41 = arith.constant 1 : index
    %c0_42 = arith.constant 0 : index
    %c0_43 = arith.constant 0 : index
    %74 = vector.load %arg3[%c1_41, %c0_42, %c0_43] : memref<2x2x32xf32, #tpu.memory_space<vmem>>, vector<1x2x32xf32>
    %75 = vector.shape_cast %74 : vector<1x2x32xf32> to vector<2x32xf32>
    %76 = arith.mulf %65, %75 : vector<2x32xf32>
    %77 = arith.mulf %59, %67 : vector<2x32xf32>
    %78 = arith.addf %76, %77 : vector<2x32xf32>
    %79 = math.tanh %78 : vector<2x32xf32>
    %80 = arith.mulf %73, %79 : vector<2x32xf32>
    %c1_44 = arith.constant 1 : index
    %c0_45 = arith.constant 0 : index
    %c0_46 = arith.constant 0 : index
    %81 = vector.load %arg7[%c1_44, %c0_45, %c0_46] : memref<2x2x64xf32, #tpu.memory_space<vmem>>, vector<1x2x32xf32>
    %82 = vector.shape_cast %81 : vector<1x2x32xf32> to vector<2x32xf32>
    %83 = vector.shape_cast %80 : vector<2x32xf32> to vector<1x2x32xf32>
    tpu.vector_store %arg7[%c1_44, %c0_45, %c0_46], %83 {strides = array<i32>} : memref<2x2x64xf32, #tpu.memory_space<vmem>>, vector<1x2x32xf32>,
    %c1_47 = arith.constant 1 : index
    %c0_48 = arith.constant 0 : index
    %c32_49 = arith.constant 32 : index
    %84 = vector.load %arg7[%c1_47, %c0_48, %c32_49] : memref<2x2x64xf32, #tpu.memory_space<vmem>>, vector<1x2x32xf32>
    %85 = vector.shape_cast %84 : vector<1x2x32xf32> to vector<2x32xf32>
    %86 = vector.shape_cast %78 : vector<2x32xf32> to vector<1x2x32xf32>
    tpu.vector_store %arg7[%c1_47, %c0_48, %c32_49], %86 {strides = array<i32>} : memref<2x2x64xf32, #tpu.memory_space<vmem>>, vector<1x2x32xf32>,
    %87 = arith.truncf %80 : vector<2x32xf32> to vector<2x32xbf16>
    %c0_50 = arith.constant 0 : index
    %c0_51 = arith.constant 0 : index
    %88 = vector.load %arg5[%c0_50, %c0_51] : memref<32x128xbf16, #tpu.memory_space<vmem>>, vector<32x128xbf16>
    %cst_52 = arith.constant dense<0.000000e+00> : vector<2x128xf32>
    %89 = tpu.matmul %87, %88, %cst_52 {dimension_numbers = #tpu.dot_dimension_numbers<[1], [0], [0], [1], [0, 0, 1, 1], [], []>} : vector<2x32xbf16>, vector<32x128xbf16>, vector<2x128xf32> -> vector<2x128xf32>
    %c0_53 = arith.constant 0 : index
    %c0_54 = arith.constant 0 : index
    %90 = vector.load %arg6[%c0_53, %c0_54] : memref<1x128xf32, #tpu.memory_space<vmem>>, vector<1x128xf32>
    %91 = vector.broadcast %90 : vector<1x128xf32> to vector<2x128xf32>
    %92 = arith.addf %89, %91 : vector<2x128xf32>
    %c0_55 = arith.constant 0 : index
    %c0_56 = arith.constant 0 : index
    %93 = vector.load %arg8[%c0_55, %c0_56] : memref<2x128xf32, #tpu.memory_space<vmem>>, vector<2x128xf32>
    tpu.vector_store %arg8[%c0_55, %c0_56], %92 {strides = array<i32>} : memref<2x128xf32, #tpu.memory_space<vmem>>, vector<2x128xf32>,
    return
  }
  func.func @transform_0(%arg0: i32) -> (i32, i32) {
    %c0_i32 = arith.constant 0 : i32
    %c0_i32_0 = arith.constant 0 : i32
    return %arg0, %c0_i32 : i32, i32
  }
  func.func @transform_1(%arg0: i32) -> (i32, i32, i32) {
    %c0_i32 = arith.constant 0 : i32
    %c0_i32_0 = arith.constant 0 : i32
    %c0_i32_1 = arith.constant 0 : i32
    return %c0_i32, %arg0, %c0_i32_0 : i32, i32, i32
  }
  func.func @transform_2(%arg0: i32) -> (i32, i32, i32) {
    %c0_i32 = arith.constant 0 : i32
    %c0_i32_0 = arith.constant 0 : i32
    %c0_i32_1 = arith.constant 0 : i32
    return %c0_i32, %arg0, %c0_i32_0 : i32, i32, i32
  }
  func.func @transform_3(%arg0: i32) -> (i32, i32, i32) {
    %c0_i32 = arith.constant 0 : i32
    %c0_i32_0 = arith.constant 0 : i32
    %c0_i32_1 = arith.constant 0 : i32
    %c0_i32_2 = arith.constant 0 : i32
    return %c0_i32, %c0_i32_0, %c0_i32_1 : i32, i32, i32
  }
  func.func @transform_4(%arg0: i32) -> (i32, i32) {
    %c0_i32 = arith.constant 0 : i32
    %c0_i32_0 = arith.constant 0 : i32
    %c0_i32_1 = arith.constant 0 : i32
    return %c0_i32, %c0_i32_0 : i32, i32
  }
  func.func @transform_5(%arg0: i32) -> (i32, i32) {
    %c0_i32 = arith.constant 0 : i32
    %c0_i32_0 = arith.constant 0 : i32
    %c0_i32_1 = arith.constant 0 : i32
    return %c0_i32, %c0_i32_0 : i32, i32
  }
  func.func @transform_6(%arg0: i32) -> (i32, i32, i32) {
    %c0_i32 = arith.constant 0 : i32
    %c0_i32_0 = arith.constant 0 : i32
    %c0_i32_1 = arith.constant 0 : i32
    return %c0_i32, %arg0, %c0_i32_0 : i32, i32, i32
  }
  func.func @transform_7(%arg0: i32) -> (i32, i32) {
    %c0_i32 = arith.constant 0 : i32
    %c0_i32_0 = arith.constant 0 : i32
    return %arg0, %c0_i32 : i32, i32
  }
}

</mosaic_0001>

<bundles_post_ra>
// kernel: tpu_custom_call.1
= control target key start
LH: loop header
LB: loop body
LE: loop exit
PB: predicated region body
PF: predicated region fallthrough
CT: control target
= control target key end

     0   :  { %13 = vsyncpa [#allocation4], 0  ;;  %s560_s26 = smov 32   ;;  %v561_v1 = vmov 0.0   ;;  %vm29_vm0 = vcmask 254976   ;;  %vm31_vm1 = vcmask 525824   ;;  %s730_s0 = inlined_call_operand.vmem [shape: f32[2,32], index: 0, kind: input, shape index: {}]   ;;  %s731_s1 = inlined_call_operand.vmem [shape: f32[2,2,32], index: 1, kind: input, shape index: {}]   ;;  %s732_s2 = inlined_call_operand.vmem [shape: f32[2,2,32], index: 2, kind: input, shape index: {}]   ;;  %s733_s3 = inlined_call_operand.vmem [shape: bf16[2,65,128], index: 3, kind: input, shape index: {}]   ;;  %s734_s4 = inlined_call_operand.vmem [shape: bf16[32,128], index: 4, kind: input, shape index: {}]   ;;  %s735_s5 = inlined_call_operand.vmem [shape: f32[1,128], index: 5, kind: input, shape index: {}]   ;;  %s736_s6 = inlined_call_operand.hbm [shape: f32[2,2,64], index: 6, kind: output, shape index: {0}]   ;;  %s737_s7 = inlined_call_operand.hbm [shape: f32[2,128], index: 7, kind: output, shape index: {1}]  }
   0x1   :  { %v33_v0 = vld [vmem:[%s731_s1] sm:$0x3]  ;;  %439 = vmatprep.subr.bf16.mxu0 %v561_v1  ;;  %453 = vmatprep.subr.bf16.mxu1 %v561_v1  ;;  %v485_v3 = vld [vmem:[%s733_s3 + $0x8] sm:$0xff]   ;;  %v562_v5 = vmov 1.0   ;;  %v486_v6 = vld [vmem:[%s733_s3 + $0x10] sm:$0xff]   ;;  %vm82_vm2 = vcmask 1040384  }
   0x2   :  { %35 = vrot.lane.b32.xlu0 %v33_v0, %s560_s26  ;;  %v484_v2 = vld [vmem:[%s733_s3] sm:$0xff]   ;;  %vm563_vm3 = vmmov 0   ;;  %v487_v8 = vld [vmem:[%s733_s3 + $0x18] sm:$0xff]  }
   0x3   :  { %440 = vmatpush3.bf16.msra.mxu0 %v484_v2  ;;  %v28_v4 = vld [vmem:[%s730_s0] sm:$0x3]  ;;  %449 = vmatprep.mubr.msk.bf16.mxu0 %vm563_vm3, %v561_v1 }
   0x4   :  { %441 = vmatprep.subr.bf16.mxu0 %v561_v1  ;;  %30 = vst.msk [vmem:[#allocation2] sm:$0x3] %vm29_vm0, %v28_v4  ;;  %v135_v7 = vld [vmem:[%s732_s2] sm:$0x3]  ;;  %463 = vmatprep.mubr.msk.bf16.mxu1 %vm563_vm3, %v561_v1 }
   0x5   :  { %32 = vst.msk [vmem:[#allocation2] sm:$0x3] %vm31_vm1, %v562_v5  ;;  %137 = vrot.lane.b32.xlu1 %v135_v7, %s560_s26  ;;  %v488_v9 = vld [vmem:[%s733_s3 + $0x20] ss:$0 sps:$4 sm:$0x11]  }
   0x7   :  { %442 = vmatpush3.bf16.msra.mxu0 %v485_v3 }
   0x8   :  { %443 = vmatprep.subr.bf16.mxu0 %v561_v1 }
   0xb   :  { %444 = vmatpush3.bf16.msra.mxu0 %v486_v6 }
   0xc   :  { %14 = vsyncpa [#allocation6], 0  ;;  %445 = vmatprep.subr.bf16.mxu0 %v561_v1  ;;  %v564_v10 = vmov 0   ;;  %vm38_vm4 = vcmask 517376   ;;  %vm78_vm5 = vcmask 531456   ;;  %s565_s17 = smov 64  }
   0xd   :  { %v84_v11 = vsel %vm82_vm2, 65535, %v564_v10  ;;  %v489_v31 = vld [vmem:[%s733_s3 + $0x24] sm:$0xff]   ;;  %v490_v32 = vld [vmem:[%s733_s3 + $0x2c] sm:$0xff]   ;;  %v402_v34 = vld [vmem:[%s731_s1 + $0x2] sm:$0x3]  ;;  %vm320_vm6 = vcmask 261120  }
   0xe   :  { %v86_v12 = vand.u32 %v488_v9, %v84_v11  ;;  %454 = vmatpush3.bf16.msra.mxu1 %v489_v31  ;;  %v491_v35 = vld [vmem:[%s733_s3 + $0x34] sm:$0xff]   ;;  %v492_v36 = vld [vmem:[%s733_s3 + $0x3c] sm:$0xff]   ;;  %v493_v37 = vld [vmem:[%s733_s3 + $0x44] ss:$0 sps:$4 sm:$0x11]  }
   0xf   :  { %446 = vmatpush3.bf16.msra.mxu0 %v487_v8  ;;  %455 = vmatprep.subr.bf16.mxu1 %v561_v1  ;;  %v214_v38 = vand.u32 %v493_v37, %v84_v11  ;;  %v419_v41 = vld [vmem:[%s732_s2 + $0x2] sm:$0x3]  ;;  %v495_v62 = vld [vmem:[%s734_s4 + $0x8] sm:$0xff]  }
  0x10   :  { %447 = vmatprep.subr.bf16.mxu0 %v561_v1  ;;  %v494_v61 = vld [vmem:[%s734_s4] sm:$0xff]   ;;  %s566_s4 = smov [#allocation3]  }
  0x11   :  { %s370_s11 = sshll.u32 %s566_s4, 4  ;;  %s371_s11 = int_to_ptr.vmem [resolvable:$true] %s370_s11 }
  0x12   :  { %456 = vmatpush3.bf16.msra.mxu1 %v490_v32  ;;  %s512_s12 = scalar_lea.vmem %s371_s11, 64  ;;  %p517_p1 = scmp.lt.s32.totalorder %s371_s11, %s371_s11 }
  0x13   :  { %448 = vmatpush3.bf16.msra.mxu0 %v86_v12  ;;  %457 = vmatprep.subr.bf16.mxu1 %v561_v1  ;;  %p513_p0 = scmp.ne.s32.totalorder %s371_s11, %s512_s12  ;;  %p518_p2 = scmp.lt.s32.totalorder %s512_s12, %s512_s12 }
  0x14   :  { %467 = vmatprep.subr.bf16.mxu0 %v561_v1 }
  0x15   :  { %p519_p3 = por %p518_p2, %p517_p1 }
  0x16   :  { %458 = vmatpush3.bf16.msra.mxu1 %v491_v35 }
  0x17   :  { %459 = vmatprep.subr.bf16.mxu1 %v561_v1  ;;  %p520_p4 = pnand %p519_p3, %p513_p0 }
  0x1a   :  { %460 = vmatpush3.bf16.msra.mxu1 %v492_v36 }
  0x1b   :  { %461 = vmatprep.subr.bf16.mxu1 %v561_v1 }
  0x1e   :  { %462 = vmatpush3.bf16.msra.mxu1 %v214_v38 }
  0x74   :  { %v36_v13 = vpop.permute.xlu0 %35 }
  0x75   :  { %39 = vst.msk [vmem:[#allocation2] sm:$0x3] %vm38_vm4, %v36_v13 }
  0x77   :  { %v138_v27 = vpop.permute.xlu1 %137 }
  0x7c   :  { %v40_v14 = vld [vmem:[#allocation2] sm:$0x3] }
  0x7d   :  { %v41_v15 = vpack.c.bf16 %v40_v14, %v40_v14 }
  0x7f   :  { %450 = vmatmul.mubr.msk.bf16.vlgmr.msra.gmra.mrb[0].mxu0 %vm78_vm5, %v41_v15 }
  0x80   :  { %471 = vmatprep.mubr.msk.bf16.mxu0 %vm563_vm3, %v561_v1  ;;  %468 = vmatpush3.bf16.msra.mxu0 %v494_v61 }
  0x81   :  { %469 = vmatprep.subr.bf16.mxu0 %v561_v1 }
  0x84   :  { %470 = vmatpush3.bf16.msra.mxu0 %v495_v62 }
 0x152   :  { %v122_v16 = vpop.f32.mrb[0].mxu0 }
 0x153   :  { %496 = vtanh.f32 %v122_v16  ;;  %v451_v17 = vpop.f32.mrb[1].mxu0  ;;  %v401_v21 = vmul.f32 -1.442695, %v122_v16 }
 0x154   :  { %v125_v18 = vpop.f32.mrb[2].mxu0 }
 0x155   :  { %v452_v19 = vpop.f32.mrb[3].mxu0  ;;  %498 = vpow2.f32 %v401_v21 }
 0x15d   :  { %v497_v20 = vpop.eup %496 }
 0x15e   :  { %142 = vrot.lane.b32.xlu0 %v497_v20, %s565_s17 }
 0x15f   :  { %v499_v22 = vpop.eup %498 }
 0x160   :  { %v131_v23 = vadd.f32 1.0, %v499_v22 }
 0x162   :  { %500 = vrcp.f32 %v131_v23 }
 0x16c   :  { %v501_v24 = vpop.eup %500 }
 0x16d   :  { %v140_v28 = vmul.f32 %v501_v24, %v138_v27 }
 0x1d0   :  { %v143_v25 = vpop.permute.xlu0 %142 }
 0x1d1   :  { %v145_v26 = vmul.f32 %v501_v24, %v143_v25 }
 0x1d3   :  { %147 = vrot.lane.b32.xlu1 %v145_v26, %s560_s26 }
 0x245   :  { %v148_v29 = vpop.permute.xlu1 %147 }
 0x246   :  { %v150_v30 = vadd.f32 %v148_v29, %v140_v28 }
 0x248   :  { %502 = vtanh.f32 %v150_v30 }
 0x252   :  { %v503_v33 = vpop.eup %502 }
 0x253   :  { %153 = vrot.lane.b32.xlu0 %v503_v33, %s565_s17 }
 0x257   :  { %167 = vrot.lane.b32.xlu0 %v402_v34, %s560_s26 }
 0x25b   :  { %266 = vrot.lane.b32.xlu0 %v419_v41, %s560_s26 }
 0x2c5   :  { %v154_v39 = vpop.permute.xlu0 %153 }
 0x2c6   :  { %v156_v40 = vmul.f32 %v501_v24, %v154_v39 }
 0x2c8   :  { %158 = vrot.lane.b32.xlu1 %v156_v40, %s560_s26 }
 0x2c9   :  { %v168_v42 = vpop.permute.xlu0 %167 }
 0x2cd   :  { %v267_v57 = vpop.permute.xlu0 %266 }
 0x33a   :  { %v159_v43 = vpop.permute.xlu1 %158 }
 0x33b   :  { %161 = vst.msk [vmem:[#allocation3] sm:$0x3] %vm29_vm0, %v159_v43  ;;  %163 = vst.msk [vmem:[#allocation2] sm:$0x3] %vm29_vm0, %v159_v43 }
 0x33c   :  { %162 = vst.msk [vmem:[#allocation3] sm:$0x3] %vm38_vm4, %v150_v30  ;;  %170 = vst.msk [vmem:[#allocation2] sm:$0x3] %vm38_vm4, %v168_v42 }
 0x343   :  { %v171_v44 = vld [vmem:[#allocation2] sm:$0x3] }
 0x344   :  { %v172_v45 = vpack.c.bf16 %v171_v44, %v171_v44 }
 0x346   :  { %464 = vmatmul.mubr.msk.bf16.vlgmr.msra.gmra.mrb[0].mxu1 %vm78_vm5, %v172_v45 }
 0x419   :  { %v250_v46 = vpop.f32.mrb[0].mxu1 }
 0x41a   :  { %504 = vtanh.f32 %v250_v46  ;;  %v465_v47 = vpop.f32.mrb[1].mxu1  ;;  %v418_v51 = vmul.f32 -1.442695, %v250_v46 }
 0x41b   :  { %v253_v48 = vpop.f32.mrb[2].mxu1 }
 0x41c   :  { %v466_v49 = vpop.f32.mrb[3].mxu1  ;;  %506 = vpow2.f32 %v418_v51 }
 0x424   :  { %v505_v50 = vpop.eup %504 }
 0x425   :  { %271 = vrot.lane.b32.xlu1 %v505_v50, %s565_s17 }
 0x426   :  { %v507_v52 = vpop.eup %506 }
 0x427   :  { %v259_v53 = vadd.f32 1.0, %v507_v52 }
 0x429   :  { %508 = vrcp.f32 %v259_v53 }
 0x433   :  { %v509_v54 = vpop.eup %508 }
 0x434   :  { %v269_v58 = vmul.f32 %v509_v54, %v267_v57 }
 0x497   :  { %v272_v55 = vpop.permute.xlu1 %271 }
 0x498   :  { %v274_v56 = vmul.f32 %v509_v54, %v272_v55 }
 0x49a   :  { %276 = vrot.lane.b32.xlu1 %v274_v56, %s560_s26 }
 0x50c   :  { %v277_v59 = vpop.permute.xlu1 %276 }
 0x50d   :  { %v279_v60 = vadd.f32 %v277_v59, %v269_v58 }
 0x50f   :  { %510 = vtanh.f32 %v279_v60 }
 0x519   :  { %v511_v63 = vpop.eup %510 }
 0x51a   :  { %282 = vrot.lane.b32.xlu0 %v511_v63, %s565_s17 }
 0x58c   :  { %v283_v0 = vpop.permute.xlu0 %282 }
 0x58d   :  { %v285_v2 = vmul.f32 %v509_v54, %v283_v0 }
 0x58f   :  { %v293_v3 = vpack.c.bf16 %v285_v2, %v285_v2  ;;  %287 = vrot.lane.b32.xlu0 %v285_v2, %s560_s26 }
 0x591   :  { %306 = vrot.lane.b32.xlu1 %v293_v3, %s560_s26 }
 0x601   :  { %v288_v4 = vpop.permute.xlu0 %287 }
 0x602   :  { %291 = vst.msk [vmem:[#allocation3 + $0x2] sm:$0x3] %vm29_vm0, %v288_v4 }
 0x603   :  { %292 = vst.msk [vmem:[#allocation3 + $0x2] sm:$0x3] %vm38_vm4, %v279_v60  ;;  %v307_v5 = vpop.permute.xlu1 %306 }
 0x604   :  { %472 = vmatmul.mubr.msk.bf16.vlgmr.msra.gmra.mrb[4].mxu0 %vm320_vm6, %v307_v5 }
 0x605   :  { %523 = shalt.err (!%p520_p4)
}
 0x606   :  { %s524_s14 = scalar_lea.hbm %s736_s6, 64 }
 0x607   :  { %p525_p5 = scmp.ne.s32.totalorder %s736_s6, %s524_s14  ;;  %p528_p6 = scmp.lt.u32.totalorder %s524_s14, %s736_s6 }
 0x609   :  { %p530_p7 = pnand %p528_p6, %p525_p5 }
 0x60b   :  { %533 = shalt.err (!%p530_p7)
}
 0x60c   :  { %s567_s19 = smov 2   ;;  %v420_v1 = vld [vmem:[%s735_s5] ss:$0 sm:$0xff]  ;;  %s568_s24 = smov [#allocation5]  }
 0x60d   :  { %376 = dma.vmem_to_hbm [thread:$0]  %s371_s11, 64, %s736_s6, [#allocation4], %s560_s26, %s560_s26, %s567_s19  }
 0x60e   :  { %s383_s25 = sshll.u32 %s568_s24, 4  ;;  %s384_s25 = int_to_ptr.vmem [resolvable:$true] %s383_s25 }
 0x60f   :  { %s534_s27 = scalar_lea.vmem %s384_s25, 32  ;;  %p539_p9 = scmp.lt.s32.totalorder %s384_s25, %s384_s25 }
 0x610   :  { %p535_p8 = scmp.ne.s32.totalorder %s384_s25, %s534_s27  ;;  %p540_p10 = scmp.lt.s32.totalorder %s534_s27, %s534_s27 }
 0x612   :  { %p541_p11 = por %p540_p10, %p539_p9 }
 0x614   :  { %p542_p12 = pnand %p541_p11, %p535_p8 }
 0x6d7   :  { %v358_v6 = vpop.f32.mrb[4].mxu0 }
 0x6d8   :  { %v359_v7 = vadd.f32 %v420_v1, %v358_v6  ;;  %v473_v8 = vpop.f32.mrb[5].mxu0 }
 0x6d9   :  { %v361_v9 = vpop.f32.mrb[6].mxu0 }
 0x6da   :  { %364 = vst [vmem:[#allocation5] sm:$0x3] %v359_v7  ;;  %v474_v10 = vpop.f32.mrb[7].mxu0 }
 0x6db   :  { %545 = shalt.err (!%p542_p12)
}
 0x6dc   :  { %s546_s5 = scalar_lea.hbm %s737_s7, 32 }
 0x6dd   :  { %p547_p13 = scmp.ne.s32.totalorder %s737_s7, %s546_s5  ;;  %p550_p0 = scmp.lt.u32.totalorder %s546_s5, %s737_s7 }
 0x6df   :  { %p552_p1 = pnand %p550_p0, %p547_p13 }
 0x6e1   :  { %555 = shalt.err (!%p552_p1)
}
 0x6e2   :  { %386 = dma.vmem_to_hbm [thread:$0]  %s384_s25, 32, %s737_s7, [#allocation6]  }
 0x6e3   :  { %556 = dma.done.wait [#allocation4], 64  }
 0x6e4   :  { %557 = vsyncadd [#allocation4], 4294967232 }
 0x6e5   :  { %558 = dma.done.wait [#allocation6], 32  }
 0x6e6   :  { %559 = vsyncadd [#allocation6], 4294967264 }
 0x6e7   :  { %393 = vsyncpa [#allocation4], 1 }
 0x6e8   :  { %394 = vsyncpa [#allocation6], 1 }

</bundles_post_ra>
